<compile_context>
chip_gen: v7x
topology: tpu7x:2x2x1
jax: 0.10.0
libtpu: 0.0.40
codegen_flags: <defaults>
</compile_context>

<pallas_src>
import functools

import jax
import jax.numpy as jnp
import numpy as np
from jax.experimental import pallas as pl
from jax.experimental.pallas import tpu as pltpu

HIDDEN = 256        # embed_layer_* / common_layer width (hard-coded in module)
HEAD_HIDDEN = 128   # value_layer1 / advantage_layer1 width


def _round_up(x, m):
    return ((x + m - 1) // m) * m


def generator_kernel(x_ref, w_emb_ref, b_ref, w_rest_hbm, out_ref,
                     w_rest, sem, *, num_particles, head2_width):
    """Whole Generator MLP in one kernel invocation.

    x_ref      : (B, emb_rows)        [state | noise | zero-pad], emb_rows=16
    w_emb_ref  : (emb_rows, 512)      block-diag fused embedding weights (VMEM)
    b_ref      : (1, 512 + rest_cols) packed biases (VMEM)
    w_rest_hbm : (256, rest_cols)     common + head1 + head2 weights (HBM/ANY)
    out_ref    : (B, head2_width)     [value | advantage | zero-pad], lane-dense
    w_rest     : VMEM scratch for the streamed blob
    sem        : DMA semaphore
    """
    # Start streaming the big common/heads blob HBM -> VMEM immediately; the
    # embedding stage below only touches the small resident blob, so its MXU /
    # VPU work overlaps with this transfer.
    cp = pltpu.make_async_copy(w_rest_hbm, w_rest, sem)
    cp.start()

    x = x_ref[...]                                            # (B, 16)

    # ---- layer 1: fused block-diagonal state/noise embeddings -> (B, 512)
    emb = jnp.dot(x, w_emb_ref[...],
                  preferred_element_type=jnp.float32) + b_ref[:, :2 * HIDDEN]
    emb = jnp.maximum(emb, 0.0)
    h = emb[:, :HIDDEN] * emb[:, HIDDEN:]                     # torch.mul -> (B, 256)

    cp.wait()                                                 # rest blob resident now

    bias_off = 2 * HIDDEN

    def linear(xv, lo, hi):
        # Static, 128-aligned column slices of the streamed blob.
        return (jnp.dot(xv, w_rest[:, lo:hi],
                        preferred_element_type=jnp.float32)
                + b_ref[:, bias_off + lo:bias_off + hi])

    # ---- common layer -> (B, 256)
    c0 = 0
    h = jnp.maximum(linear(h, c0, c0 + HIDDEN), 0.0)
    c0 += HIDDEN

    # ---- fused stage-1 heads: [value_hidden | advantage_hidden] -> (B, 256)
    h1 = jnp.maximum(linear(h, c0, c0 + 2 * HEAD_HIDDEN), 0.0)
    c0 += 2 * HEAD_HIDDEN

    # ---- fused block-diagonal stage-2 heads, lane-padded -> (B, head2_width)
    y = linear(h1, c0, c0 + head2_width)

    # Final ReLU applies to the value head only (advantage head has none).
    # Keep this as a where-mask on the lane-dense slab: one vreg of VPU work,
    # no masked partial stores (the 32-column split is not 128-aligned).
    col = jax.lax.broadcasted_iota(jnp.int32, y.shape, 1)
    out_ref[...] = jnp.where(col < num_particles, jnp.maximum(y, 0.0), y)


def pack_params(params, state_size, noise_size, num_particles, num_actions):
    """Pack weights into a small embedding blob, a common/heads blob and biases.

    w_emb (emb_rows, 512): rows 0:state_size -> embed_layer_state (cols 0:256)
                           rows state_size:state_size+noise_size
                                             -> embed_layer_noise (cols 256:512)
                           remaining rows are zero padding.
    w_rest (256, rest_cols), columns (all offsets multiples of 128):
      [0:256)                 common_layer
      [256:512)               fused [value_layer1 | advantage_layer1]
      [512:512+head2_width)   block-diag fused [value_layer2 | advantage_layer2]
                              (rows 0:128 value, rows 128:256 advantage),
                              lane-padded to head2_width.
    b (1, 512 + rest_cols): biases in the same column order
      (embedding biases first, then the rest-blob biases).
    """
    assert state_size + noise_size <= HIDDEN
    emb_rows = _round_up(state_size + noise_size, 8)          # 13 -> 16
    head2_width = max(128, _round_up(num_particles + num_actions, 128))
    rest_cols = HIDDEN + 2 * HEAD_HIDDEN + head2_width        # 640 here

    w_emb = np.zeros((emb_rows, 2 * HIDDEN), np.float32)
    w_emb[0:state_size, 0:HIDDEN] = np.asarray(params["w_es"])
    w_emb[state_size:state_size + noise_size,
          HIDDEN:2 * HIDDEN] = np.asarray(params["w_en"])

    w_rest = np.zeros((HIDDEN, rest_cols), np.float32)
    c0 = 0
    w_rest[:, c0:c0 + HIDDEN] = np.asarray(params["w_c"])
    c0 += HIDDEN
    w_rest[:, c0:c0 + HEAD_HIDDEN] = np.asarray(params["w_v1"])
    w_rest[:, c0 + HEAD_HIDDEN:c0 + 2 * HEAD_HIDDEN] = np.asarray(params["w_a1"])
    c0 += 2 * HEAD_HIDDEN
    # Block-diagonal stage-2 heads (off-diagonal blocks stay exactly 0).
    w_rest[0:HEAD_HIDDEN, c0:c0 + num_particles] = np.asarray(params["w_v2"])
    w_rest[HEAD_HIDDEN:2 * HEAD_HIDDEN,
           c0 + num_particles:c0 + num_particles + num_actions] = np.asarray(
               params["w_a2"])

    b = np.zeros((1, 2 * HIDDEN + rest_cols), np.float32)
    off = 0
    b[:, off:off + HIDDEN] = np.asarray(params["b_es"]); off += HIDDEN
    b[:, off:off + HIDDEN] = np.asarray(params["b_en"]); off += HIDDEN
    b[:, off:off + HIDDEN] = np.asarray(params["b_c"]);  off += HIDDEN
    b[:, off:off + HEAD_HIDDEN] = np.asarray(params["b_v1"]); off += HEAD_HIDDEN
    b[:, off:off + HEAD_HIDDEN] = np.asarray(params["b_a1"]); off += HEAD_HIDDEN
    b[:, off:off + num_particles] = np.asarray(params["b_v2"])
    b[:, off + num_particles:off + num_particles + num_actions] = np.asarray(
        params["b_a2"])

    return (jnp.asarray(w_emb), jnp.asarray(w_rest), jnp.asarray(b),
            emb_rows, head2_width)


def generator_forward(state, noise, w_emb, w_rest, b_blob, *,
                      num_particles, num_actions, head2_width, emb_rows):
    B, state_size = state.shape
    noise_size = noise.shape[1]
    assert state_size + noise_size <= emb_rows

    # Single concat + tiny pad (fused under jit) instead of zeros + 2 updates.
    xin = jnp.concatenate([state, noise], axis=-1).astype(jnp.float32)
    pad = emb_rows - (state_size + noise_size)
    if pad:
        xin = jnp.pad(xin, ((0, 0), (0, pad)))

    kernel = functools.partial(generator_kernel,
                               num_particles=num_particles,
                               head2_width=head2_width)
    rest_rows, rest_cols = w_rest.shape

    # Gridless: everything resident (< 1 MB VMEM) -> no pipeline scaffolding.
    # NOTE: a batch grid with dimension_semantics=("parallel",) (to use both
    # v7x TensorCores) only pays off once B grows well beyond 8 (~128 on v5e,
    # ~256 on v6e/v7x).
    out = pl.pallas_call(
        kernel,
        out_shape=jax.ShapeDtypeStruct((B, head2_width), jnp.float32),
        in_specs=[
            pl.BlockSpec(memory_space=pltpu.MemorySpace.VMEM),   # x
            pl.BlockSpec(memory_space=pltpu.MemorySpace.VMEM),   # w_emb
            pl.BlockSpec(memory_space=pltpu.MemorySpace.VMEM),   # biases
            pl.BlockSpec(memory_space=pl.ANY),                   # w_rest (HBM)
        ],
        out_specs=pl.BlockSpec(memory_space=pltpu.MemorySpace.VMEM),
        scratch_shapes=[
            pltpu.VMEM((rest_rows, rest_cols), jnp.float32),     # streamed blob
            pltpu.SemaphoreType.DMA,
        ],
    )(xin, w_emb, b_blob, w_rest)

    value = out[:, :num_particles]
    adv = out[:, num_particles:num_particles + num_actions]
    return value, adv


def make_params(key, state_size, noise_size, num_particles, num_actions):
    """Deterministic synthetic weights; shapes mirror the PyTorch module,
    but stored as (in, out) so y = x @ W + b."""
    dims = {
        "es": (state_size, HIDDEN),
        "en": (noise_size, HIDDEN),
        "c":  (HIDDEN, HIDDEN),
        "v1": (HIDDEN, HEAD_HIDDEN),
        "v2": (HEAD_HIDDEN, num_particles),
        "a1": (HIDDEN, HEAD_HIDDEN),
        "a2": (HEAD_HIDDEN, num_actions),
    }
    params = {}
    keys = jax.random.split(key, len(dims))
    for k_rng, (name, (fan_in, fan_out)) in zip(keys, dims.items()):
        scale = 1.0 / np.sqrt(fan_in)
        params["w_" + name] = (scale * jax.random.normal(
            k_rng, (fan_in, fan_out))).astype(jnp.float32)
        params["b_" + name] = jnp.zeros((1, fan_out), jnp.float32)
    return params


def reference_forward(state, noise, params):
    relu = lambda v: jnp.maximum(v, 0.0)
    lin = lambda x, n: x @ params["w_" + n] + params["b_" + n]
    s = relu(lin(state, "es"))
    n = relu(lin(noise, "en"))
    x = relu(lin(s * n, "c"))
    v = relu(lin(relu(lin(x, "v1")), "v2"))
    a = lin(relu(lin(x, "a1")), "a2")
    return v, a


if __name__ == "__main__":
    B = 8
    state_size = 3
    noise_size = 10
    num_particles = 32
    num_actions = 16   # stands in for len(action_space(total, num))

    key = jax.random.PRNGKey(0)
    k_state, k_noise, k_params = jax.random.split(key, 3)

    state = jax.random.normal(k_state, (B, state_size), jnp.float32)
    noise = jax.random.normal(k_noise, (B, noise_size), jnp.float32)
    params = make_params(k_params, state_size, noise_size,
                         num_particles, num_actions)

    w_emb, w_rest, b_blob, emb_rows, head2_width = pack_params(
        params, state_size, noise_size, num_particles, num_actions)

    fwd = jax.jit(functools.partial(
        generator_forward,
        num_particles=num_particles, num_actions=num_actions,
        head2_width=head2_width, emb_rows=emb_rows))

    value, adv = fwd(state, noise, w_emb, w_rest, b_blob)
    jax.block_until_ready((value, adv))

    v_ref, a_ref = reference_forward(state, noise, params)
    np.testing.assert_allclose(np.asarray(value), np.asarray(v_ref),
                               rtol=1e-5, atol=1e-5)
    np.testing.assert_allclose(np.asarray(adv), np.asarray(a_ref),
                               rtol=1e-5, atol=1e-5)

    print("KERNEL_OK")
</pallas_src>

<mosaic_0001>
module attributes {stable_mosaic.version = 11 : i64} {
  func.func @generator_kernel(%arg0: memref<8x16xf32, #tpu.memory_space<vmem>>, %arg1: memref<16x512xf32, #tpu.memory_space<vmem>>, %arg2: memref<1x1152xf32, #tpu.memory_space<vmem>>, %arg3: memref<256x640xf32, #tpu.memory_space<any>>, %arg4: memref<8x128xf32, #tpu.memory_space<vmem>>, %arg5: memref<256x640xf32, #tpu.memory_space<vmem>>, %arg6: memref<!tpu.dma_semaphore, #tpu.memory_space<semaphore_mem>>) attributes {dimension_semantics = [], scalar_prefetch = 0 : i64, scratch_operands = 2 : i64, tpu.core_type = #tpu.core_type<tc>} {
    tpu.enqueue_dma source(%arg3 : memref<256x640xf32, #tpu.memory_space<any>>) target(%arg5 : memref<256x640xf32, #tpu.memory_space<vmem>>) target_semaphore(%arg6 : memref<!tpu.dma_semaphore, #tpu.memory_space<semaphore_mem>>)
    %c0 = arith.constant 0 : index
    %c0_0 = arith.constant 0 : index
    %0 = vector.load %arg0[%c0, %c0_0] : memref<8x16xf32, #tpu.memory_space<vmem>>, vector<8x16xf32>
    %c0_1 = arith.constant 0 : index
    %c0_2 = arith.constant 0 : index
    %1 = vector.load %arg1[%c0_1, %c0_2] : memref<16x512xf32, #tpu.memory_space<vmem>>, vector<16x512xf32>
    %cst = arith.constant dense<0.000000e+00> : vector<8x512xf32>
    %2 = tpu.matmul %0, %1, %cst {dimension_numbers = #tpu.dot_dimension_numbers<[1], [0], [0], [1], [0, 0, 1, 1], [], []>} : vector<8x16xf32>, vector<16x512xf32>, vector<8x512xf32> -> vector<8x512xf32>
    %c0_3 = arith.constant 0 : index
    %c0_4 = arith.constant 0 : index
    %3 = vector.load %arg2[%c0_3, %c0_4] : memref<1x1152xf32, #tpu.memory_space<vmem>>, vector<1x512xf32>
    %4 = vector.broadcast %3 : vector<1x512xf32> to vector<8x512xf32>
    %5 = arith.addf %2, %4 : vector<8x512xf32>
    %cst_5 = arith.constant 0.000000e+00 : f32
    %6 = vector.broadcast %cst_5 : f32 to vector<8x512xf32>
    %7 = arith.maximumf %5, %6 : vector<8x512xf32>
    %8 = vector.extract_strided_slice %7 {offsets = [0, 0], sizes = [8, 256], strides = [1, 1]} : vector<8x512xf32> to vector<8x256xf32>
    %9 = vector.extract_strided_slice %7 {offsets = [0, 256], sizes = [8, 256], strides = [1, 1]} : vector<8x512xf32> to vector<8x256xf32>
    %10 = arith.mulf %8, %9 : vector<8x256xf32>
    tpu.wait_dma2 semaphore(%arg6 : memref<!tpu.dma_semaphore, #tpu.memory_space<semaphore_mem>>) src(%arg3 : memref<256x640xf32, #tpu.memory_space<any>>) dst(%arg5 : memref<256x640xf32, #tpu.memory_space<vmem>>)
    %c0_6 = arith.constant 0 : index
    %c0_7 = arith.constant 0 : index
    %11 = vector.load %arg5[%c0_6, %c0_7] : memref<256x640xf32, #tpu.memory_space<vmem>>, vector<256x256xf32>
    %cst_8 = arith.constant dense<0.000000e+00> : vector<8x256xf32>
    %12 = tpu.matmul %10, %11, %cst_8 {dimension_numbers = #tpu.dot_dimension_numbers<[1], [0], [0], [1], [0, 0, 1, 1], [], []>} : vector<8x256xf32>, vector<256x256xf32>, vector<8x256xf32> -> vector<8x256xf32>
    %c0_9 = arith.constant 0 : index
    %c512 = arith.constant 512 : index
    %13 = vector.load %arg2[%c0_9, %c512] : memref<1x1152xf32, #tpu.memory_space<vmem>>, vector<1x256xf32>
    %14 = vector.broadcast %13 : vector<1x256xf32> to vector<8x256xf32>
    %15 = arith.addf %12, %14 : vector<8x256xf32>
    %cst_10 = arith.constant 0.000000e+00 : f32
    %16 = vector.broadcast %cst_10 : f32 to vector<8x256xf32>
    %17 = arith.maximumf %15, %16 : vector<8x256xf32>
    %c0_11 = arith.constant 0 : index
    %c256 = arith.constant 256 : index
    %18 = vector.load %arg5[%c0_11, %c256] : memref<256x640xf32, #tpu.memory_space<vmem>>, vector<256x256xf32>
    %cst_12 = arith.constant dense<0.000000e+00> : vector<8x256xf32>
    %19 = tpu.matmul %17, %18, %cst_12 {dimension_numbers = #tpu.dot_dimension_numbers<[1], [0], [0], [1], [0, 0, 1, 1], [], []>} : vector<8x256xf32>, vector<256x256xf32>, vector<8x256xf32> -> vector<8x256xf32>
    %c0_13 = arith.constant 0 : index
    %c768 = arith.constant 768 : index
    %20 = vector.load %arg2[%c0_13, %c768] : memref<1x1152xf32, #tpu.memory_space<vmem>>, vector<1x256xf32>
    %21 = vector.broadcast %20 : vector<1x256xf32> to vector<8x256xf32>
    %22 = arith.addf %19, %21 : vector<8x256xf32>
    %cst_14 = arith.constant 0.000000e+00 : f32
    %23 = vector.broadcast %cst_14 : f32 to vector<8x256xf32>
    %24 = arith.maximumf %22, %23 : vector<8x256xf32>
    %c0_15 = arith.constant 0 : index
    %c512_16 = arith.constant 512 : index
    %25 = vector.load %arg5[%c0_15, %c512_16] : memref<256x640xf32, #tpu.memory_space<vmem>>, vector<256x128xf32>
    %cst_17 = arith.constant dense<0.000000e+00> : vector<8x128xf32>
    %26 = tpu.matmul %24, %25, %cst_17 {dimension_numbers = #tpu.dot_dimension_numbers<[1], [0], [0], [1], [0, 0, 1, 1], [], []>} : vector<8x256xf32>, vector<256x128xf32>, vector<8x128xf32> -> vector<8x128xf32>
    %c0_18 = arith.constant 0 : index
    %c1024 = arith.constant 1024 : index
    %27 = vector.load %arg2[%c0_18, %c1024] : memref<1x1152xf32, #tpu.memory_space<vmem>>, vector<1x128xf32>
    %28 = vector.broadcast %27 : vector<1x128xf32> to vector<8x128xf32>
    %29 = arith.addf %26, %28 : vector<8x128xf32>
    %30 = tpu.iota {dimensions = array<i32: 1>} : vector<8x128xi32>
    %c32_i32 = arith.constant 32 : i32
    %31 = vector.broadcast %c32_i32 : i32 to vector<8x128xi32>
    %32 = arith.cmpi slt, %30, %31 : vector<8x128xi32>
    %cst_19 = arith.constant 0.000000e+00 : f32
    %33 = vector.broadcast %cst_19 : f32 to vector<8x128xf32>
    %34 = arith.maximumf %29, %33 : vector<8x128xf32>
    %35 = arith.select %32, %34, %29 : vector<8x128xi1>, vector<8x128xf32>
    %c0_20 = arith.constant 0 : index
    %c0_21 = arith.constant 0 : index
    %36 = vector.load %arg4[%c0_20, %c0_21] : memref<8x128xf32, #tpu.memory_space<vmem>>, vector<8x128xf32>
    tpu.vector_store %arg4[%c0_20, %c0_21], %35 {strides = array<i32>} : memref<8x128xf32, #tpu.memory_space<vmem>>, vector<8x128xf32>,
    return
  }
}

</mosaic_0001>

<bundles_post_ra>
// kernel: generator_forward.1
= control target key start
LH: loop header
LB: loop body
LE: loop exit
PB: predicated region body
PF: predicated region fallthrough
CT: control target
= control target key end

     0   :  { %9 = vsyncpa [#allocation5], 0  ;;  %s911_s15 = smov [#allocation4]   ;;  %s998_s0 = inlined_call_operand.vmem [shape: f32[8,16], index: 0, kind: input, shape index: {}]   ;;  %s999_s1 = inlined_call_operand.hbm [shape: f32[16,512], index: 1, kind: input, shape index: {}]   ;;  %s1000_s2 = inlined_call_operand.vmem [shape: f32[1,1152], index: 2, kind: input, shape index: {}]   ;;  %s1001_s3 = inlined_call_operand.hbm [shape: f32[256,640], index: 3, kind: input, shape index: {}]   ;;  %s1002_s4 = inlined_call_operand.vmem [shape: f32[8,128], index: 4, kind: output, shape index: {}]  }
   0x1   :  { %s17_s16 = sshll.u32 %s911_s15, 4  ;;  %s863_s19 = scalar_lea.hbm %s999_s1, 1024  ;;  %s18_s16 = int_to_ptr.vmem [resolvable:$true] %s17_s16 }
   0x2   :  { %p864_p0 = scmp.ne.s32.totalorder %s999_s1, %s863_s19  ;;  %p867_p1 = scmp.lt.u32.totalorder %s863_s19, %s999_s1 }
   0x4   :  { %p869_p2 = pnand %p867_p1, %p864_p0 }
   0x6   :  { %872 = shalt.err (!%p869_p2)
}
   0x7   :  { %s873_s24 = scalar_lea.vmem %s18_s16, 1024  ;;  %p878_p4 = scmp.lt.s32.totalorder %s18_s16, %s18_s16 }
   0x8   :  { %p874_p3 = scmp.ne.s32.totalorder %s18_s16, %s873_s24  ;;  %p879_p5 = scmp.lt.s32.totalorder %s873_s24, %s873_s24 }
   0xa   :  { %p880_p6 = por %p879_p5, %p878_p4 }
   0xc   :  { %p881_p7 = pnand %p880_p6, %p874_p3 }
   0xe   :  { %884 = shalt.err (!%p881_p7)
}
   0xf   :  { %s912_s25 = smov 512   ;;  %s913_s26 = smov 32  }
  0x10   :  { %23 = dma.hbm_to_vmem [thread:$0]  %s999_s1, 1024, %s18_s16, [#allocation5], %s912_s25, %s912_s25, %s913_s26  }
  0x11   :  { %907 = dma.done.wait [#allocation5], 1024  }
  0x12   :  { %908 = vsyncadd [#allocation5], 4294966272  ;;  %v914_v0 = vmov 0.0   ;;  %v42_v1 = vld [vmem:[#allocation4 + $0x8] sm:$0xff]  ;;  %v41_v3 = vld [vmem:[#allocation4] sm:$0xff]  ;;  %vm71_vm0 = vcmask 130048  }
  0x13   :  { %139 = vmatprep.mubr.f32.mxu1 %v914_v0  ;;  %v46_v2 = vld [vmem:[#allocation4 + $0x28] sm:$0xff]  ;;  %v45_v5 = vld [vmem:[#allocation4 + $0x20] sm:$0xff]  ;;  %v44_v6 = vld [vmem:[#allocation4 + $0x18] sm:$0xff]  ;;  %s915_s1 = smov [#allocation2]   ;;  %s885_s8 = scalar_lea.hbm %s1001_s3, 20480 }
  0x14   :  { %v690_v4 = vpack.c.bf16 %v46_v2, %v42_v1  ;;  %v692_v7 = vpack.c.bf16 %v45_v5, %v41_v3  ;;  %v48_v8 = vld [vmem:[#allocation4 + $0x38] sm:$0xff]  ;;  %v43_v9 = vld [vmem:[#allocation4 + $0x10] sm:$0xff]  ;;  %v40_v12 = vld [vmem:[%s998_s0] sm:$0xff]  ;;  %s36_s5 = sshll.u32 %s915_s1, 4  ;;  %p886_p8 = scmp.ne.s32.totalorder %s1001_s3, %s885_s8  ;;  %s37_s5 = int_to_ptr.vmem [resolvable:$true] %s36_s5 }
  0x15   :  { %v47_v10 = vld [vmem:[#allocation4 + $0x30] sm:$0xff]  ;;  %v694_v11 = vpack.c.bf16 %v48_v8, %v44_v6  ;;  %p889_p9 = scmp.lt.u32.totalorder %s885_s8, %s1001_s3 }
  0x16   :  { %691 = vmatprep.subr.bf16.mxu1 %v690_v4  ;;  %v696_v13 = vpack.c.bf16 %v47_v10, %v43_v9 }
  0x17   :  { %693 = vmatpush1.bf16.msra.mxu1 %v692_v7  ;;  %p891_p10 = pnand %p889_p9, %p886_p8 }
  0x18   :  { %695 = vmatprep.subr.bf16.mxu1 %v694_v11 }
  0x1a   :  { %651 = vmatmul.mubr.msk.f32.vlgmr.msra.gmra.mrb[0].mxu1 %vm71_vm0, %v40_v12 }
  0x1b   :  { %697 = vmatpush1.bf16.msra.mxu1 %v696_v13  ;;  %210 = vmatprep.mubr.f32.mxu1 %v914_v0 }
  0x1e   :  { %652 = vmatmul.mubr.msk.f32.vlgmr.msra.gmra.mrb[2].mxu1 %vm71_vm0, %v40_v12 }
  0x1f   :  { %894 = shalt.err (!%p891_p10)  }
  0x20   :  { %s895_s12 = scalar_lea.vmem %s37_s5, 20480  ;;  %p900_p12 = scmp.lt.s32.totalorder %s37_s5, %s37_s5 }
  0x21   :  { %p896_p11 = scmp.ne.s32.totalorder %s37_s5, %s895_s12  ;;  %p901_p13 = scmp.lt.s32.totalorder %s895_s12, %s895_s12 }
  0x23   :  { %p902_p0 = por %p901_p13, %p900_p12 }
  0x25   :  { %p903_p1 = pnand %p902_p0, %p896_p11 }
  0x27   :  { %906 = shalt.err (!%p903_p1)  }
  0x28   :  { %39 = dma.hbm_to_vmem [thread:$0]  %s1001_s3, 20480, %s37_s5, [#allocation3]  ;;  %v51_v14 = vlaneseq  ;;  %v49_v17 = vld [vmem:[%s1000_s2] sm:$0xf] }
  0x2a   :  { %v52_v15 = vshrl.u32 %v51_v14, 7 }
  0x2c   :  { %v969_v16 = vsub.s32 0, %v52_v15  ;;  %v974_v18 = vsub.s32 1, %v52_v15  ;;  %v61_v19 = vsub.s32 2, %v52_v15  ;;  %v65_v20 = vsub.s32 3, %v52_v15 }
  0x2e   :  { %v54_v21 = vrot.slane %v49_v17, %v969_v16  ;;  %v58_v23 = vrot.slane %v49_v17, %v974_v18  ;;  %v62_v25 = vrot.slane %v49_v17, %v61_v19  ;;  %v66_v26 = vrot.slane %v49_v17, %v65_v20 }
  0xed   :  { %v141_v22 = vpop.f32.mrb[0].mxu1 }
  0xee   :  { %v143_v24 = vpop.f32.mrb[1].mxu1  ;;  %v142_v27 = vadd.f32 %v141_v22, %v54_v21 }
  0xef   :  { %v144_v28 = vadd.f32 %v143_v24, %v58_v23 }
  0xf0   :  { %v217_v33 = vmax.f32 %v142_v27, 0.0 }
  0xf1   :  { %v212_v29 = vpop.f32.mrb[2].mxu1  ;;  %v218_v35 = vmax.f32 %v144_v28, 0.0 }
  0xf2   :  { %v213_v30 = vadd.f32 %v212_v29, %v62_v25  ;;  %v214_v31 = vpop.f32.mrb[3].mxu1 }
  0xf3   :  { %v215_v32 = vadd.f32 %v214_v31, %v66_v26 }
  0xf4   :  { %v219_v34 = vmax.f32 %v213_v30, 0.0 }
  0xf5   :  { %v220_v36 = vmax.f32 %v215_v32, 0.0 }
  0xf6   :  { %v978_v37 = vmul.f32 %v219_v34, %v217_v33 }
  0xf7   :  { %v222_v38 = vmul.f32 %v220_v36, %v218_v35 }
  0xf8   :  { %909 = dma.done.wait [#allocation3], 20480 }
  0xf9   :  { %910 = vsyncadd [#allocation3], 4294946816  ;;  %367 = vmatprep.mubr.f32.mxu0 %v222_v38  ;;  %v228_v39 = vld [vmem:[#allocation2 + $0x8] sm:$0xff]  ;;  %v230_v40 = vld [vmem:[#allocation2 + $0x30] sm:$0xff] }
  0xfa   :  { %v227_v41 = vld [vmem:[#allocation2] sm:$0xff]  ;;  %v698_v42 = vpack.c.bf16 %v230_v40, %v228_v39  ;;  %v229_v43 = vld [vmem:[#allocation2 + $0x28] sm:$0xff]  ;;  %v232_v44 = vld [vmem:[#allocation2 + $0x58] sm:$0xff] }
  0xfb   :  { %v234_v45 = vld [vmem:[#allocation2 + $0x80] sm:$0xff]  ;;  %v700_v46 = vpack.c.bf16 %v229_v43, %v227_v41  ;;  %v231_v48 = vld [vmem:[#allocation2 + $0x50] sm:$0xff]  ;;  %v233_v49 = vld [vmem:[#allocation2 + $0x78] sm:$0xff] }
  0xfc   :  { %v702_v47 = vpack.c.bf16 %v234_v45, %v232_v44  ;;  %v236_v50 = vld [vmem:[#allocation2 + $0xa8] sm:$0xff]  ;;  %699 = vmatprep.subr.bf16.mxu0 %v698_v42  ;;  %v238_v51 = vld [vmem:[#allocation2 + $0xd0] sm:$0xff]  ;;  %v704_v52 = vpack.c.bf16 %v233_v49, %v231_v48  ;;  %v235_v54 = vld [vmem:[#allocation2 + $0xa0] sm:$0xff] }
  0xfd   :  { %701 = vmatpush1.bf16.msra.mxu0 %v700_v46  ;;  %v706_v53 = vpack.c.bf16 %v238_v51, %v236_v50  ;;  %v237_v55 = vld [vmem:[#allocation2 + $0xc8] sm:$0xff]  ;;  %v240_v56 = vld [vmem:[#allocation2 + $0xf8] sm:$0xff]  ;;  %v242_v57 = vld [vmem:[#allocation2 + $0x120] sm:$0xff] }
  0xfe   :  { %703 = vmatprep.subr.bf16.mxu0 %v702_v47  ;;  %v708_v58 = vpack.c.bf16 %v237_v55, %v235_v54  ;;  %v710_v59 = vpack.c.bf16 %v242_v57, %v240_v56  ;;  %v239_v60 = vld [vmem:[#allocation2 + $0xf0] sm:$0xff]  ;;  %v241_v61 = vld [vmem:[#allocation2 + $0x118] sm:$0xff]  ;;  %v244_v62 = vld [vmem:[#allocation2 + $0x148] sm:$0xff] }
  0xff   :  { %v246_v63 = vld [vmem:[#allocation2 + $0x170] sm:$0xff]  ;;  %v712_v0 = vpack.c.bf16 %v241_v61, %v239_v60  ;;  %v243_v2 = vld [vmem:[#allocation2 + $0x140] sm:$0xff]  ;;  %v245_v3 = vld [vmem:[#allocation2 + $0x168] sm:$0xff] }
 0x100   :  { %v714_v1 = vpack.c.bf16 %v246_v63, %v244_v62  ;;  %v248_v4 = vld [vmem:[#allocation2 + $0x198] sm:$0xff]  ;;  %v250_v5 = vld [vmem:[#allocation2 + $0x1c0] sm:$0xff]  ;;  %v716_v6 = vpack.c.bf16 %v245_v3, %v243_v2  ;;  %v247_v8 = vld [vmem:[#allocation2 + $0x190] sm:$0xff] }
 0x101   :  { %705 = vmatpush1.bf16.msra.mxu0 %v704_v52  ;;  %v718_v7 = vpack.c.bf16 %v250_v5, %v248_v4  ;;  %v249_v9 = vld [vmem:[#allocation2 + $0x1b8] sm:$0xff]  ;;  %v252_v10 = vld [vmem:[#allocation2 + $0x1e8] sm:$0xff]  ;;  %v254_v11 = vld [vmem:[#allocation2 + $0x210] sm:$0xff] }
 0x102   :  { %707 = vmatprep.subr.bf16.mxu0 %v706_v53  ;;  %v720_v12 = vpack.c.bf16 %v249_v9, %v247_v8  ;;  %v251_v13 = vld [vmem:[#allocation2 + $0x1e0] sm:$0xff]  ;;  %v253_v15 = vld [vmem:[#allocation2 + $0x208] sm:$0xff]  ;;  %v256_v17 = vld [vmem:[#allocation2 + $0x238] sm:$0xff]  ;;  %v722_v19 = vpack.c.bf16 %v254_v11, %v252_v10 }
 0x103   :  { %v258_v20 = vld [vmem:[#allocation2 + $0x260] sm:$0xff]  ;;  %v377_v21 = vld [vmem:[#allocation2 + $0x18] sm:$0xff]  ;;  %v376_v24 = vld [vmem:[#allocation2 + $0x10] sm:$0xff]  ;;  %v724_v31 = vpack.c.bf16 %v253_v15, %v251_v13 }
 0x104   :  { %v379_v22 = vld [vmem:[#allocation2 + $0x40] sm:$0xff]  ;;  %v378_v25 = vld [vmem:[#allocation2 + $0x38] sm:$0xff]  ;;  %v381_v26 = vld [vmem:[#allocation2 + $0x68] sm:$0xff]  ;;  %v726_v35 = vpack.c.bf16 %v258_v20, %v256_v17 }
 0x105   :  { %709 = vmatpush1.bf16.msra.mxu0 %v708_v58  ;;  %v762_v23 = vpack.c.bf16 %v379_v22, %v377_v21  ;;  %v764_v27 = vpack.c.bf16 %v378_v25, %v376_v24  ;;  %v383_v28 = vld [vmem:[#allocation2 + $0x90] sm:$0xff]  ;;  %v380_v29 = vld [vmem:[#allocation2 + $0x60] sm:$0xff]  ;;  %v382_v30 = vld [vmem:[#allocation2 + $0x88] sm:$0xff] }
 0x106   :  { %711 = vmatprep.subr.bf16.mxu0 %v710_v59  ;;  %v766_v32 = vpack.c.bf16 %v383_v28, %v381_v26  ;;  %v385_v33 = vld [vmem:[#allocation2 + $0xb8] sm:$0xff]  ;;  %v387_v34 = vld [vmem:[#allocation2 + $0xe0] sm:$0xff]  ;;  %v255_v36 = vld [vmem:[#allocation2 + $0x230] sm:$0xff]  ;;  %v768_v40 = vpack.c.bf16 %v382_v30, %v380_v29 }
 0x107   :  { %763 = vmatprep.subr.bf16.mxu1 %v762_v23  ;;  %v257_v38 = vld [vmem:[#allocation2 + $0x258] sm:$0xff]  ;;  %v260_v39 = vld [vmem:[#allocation2 + $0x288] sm:$0xff]  ;;  %v262_v41 = vld [vmem:[#allocation2 + $0x2b0] sm:$0xff]  ;;  %v770_v42 = vpack.c.bf16 %v387_v34, %v385_v33 }
 0x108   :  { %765 = vmatpush1.bf16.msra.mxu1 %v764_v27  ;;  %v384_v43 = vld [vmem:[#allocation2 + $0xb0] sm:$0xff]  ;;  %v386_v44 = vld [vmem:[#allocation2 + $0xd8] sm:$0xff]  ;;  %v389_v45 = vld [vmem:[#allocation2 + $0x108] sm:$0xff]  ;;  %v728_v47 = vpack.c.bf16 %v257_v38, %v255_v36  ;;  %v730_v48 = vpack.c.bf16 %v262_v41, %v260_v39 }
 0x109   :  { %713 = vmatpush1.bf16.msra.mxu0 %v712_v0  ;;  %767 = vmatprep.subr.bf16.mxu1 %v766_v32  ;;  %v391_v46 = vld [vmem:[#allocation2 + $0x130] sm:$0xff]  ;;  %v259_v49 = vld [vmem:[#allocation2 + $0x280] sm:$0xff]  ;;  %v261_v50 = vld [vmem:[#allocation2 + $0x2a8] sm:$0xff]  ;;  %v772_v52 = vpack.c.bf16 %v386_v44, %v384_v43 }
 0x10a   :  { %715 = vmatprep.subr.bf16.mxu0 %v714_v1  ;;  %v264_v51 = vld [vmem:[#allocation2 + $0x2d8] sm:$0xff]  ;;  %v266_v53 = vld [vmem:[#allocation2 + $0x300] sm:$0xff]  ;;  %v774_v54 = vpack.c.bf16 %v391_v46, %v389_v45  ;;  %v390_v56 = vld [vmem:[#allocation2 + $0x128] sm:$0xff]  ;;  %v732_v59 = vpack.c.bf16 %v261_v50, %v259_v49 }
 0x10b   :  { %v388_v55 = vld [vmem:[#allocation2 + $0x100] sm:$0xff]  ;;  %v393_v57 = vld [vmem:[#allocation2 + $0x158] sm:$0xff]  ;;  %v734_v60 = vpack.c.bf16 %v266_v53, %v264_v51  ;;  %v263_v61 = vld [vmem:[#allocation2 + $0x2d0] sm:$0xff] }
 0x10c   :  { %769 = vmatpush1.bf16.msra.mxu1 %v768_v40  ;;  %v395_v58 = vld [vmem:[#allocation2 + $0x180] sm:$0xff]  ;;  %v265_v62 = vld [vmem:[#allocation2 + $0x2f8] sm:$0xff]  ;;  %v268_v63 = vld [vmem:[#allocation2 + $0x328] sm:$0xff]  ;;  %v776_v0 = vpack.c.bf16 %v390_v56, %v388_v55 }
 0x10d   :  { %717 = vmatpush1.bf16.msra.mxu0 %v716_v6  ;;  %771 = vmatprep.subr.bf16.mxu1 %v770_v42  ;;  %v270_v1 = vld [vmem:[#allocation2 + $0x350] sm:$0xff]  ;;  %v778_v2 = vpack.c.bf16 %v395_v58, %v393_v57  ;;  %v394_v4 = vld [vmem:[#allocation2 + $0x178] sm:$0xff]  ;;  %v397_v5 = vld [vmem:[#allocation2 + $0x1a8] sm:$0xff] }
 0x10e   :  { %719 = vmatprep.subr.bf16.mxu0 %v718_v7  ;;  %v392_v3 = vld [vmem:[#allocation2 + $0x150] sm:$0xff]  ;;  %v736_v7 = vpack.c.bf16 %v265_v62, %v263_v61  ;;  %v738_v8 = vpack.c.bf16 %v270_v1, %v268_v63  ;;  %v267_v9 = vld [vmem:[#allocation2 + $0x320] sm:$0xff]  ;;  %v269_v10 = vld [vmem:[#allocation2 + $0x348] sm:$0xff] }
 0x10f   :  { %v399_v6 = vld [vmem:[#allocation2 + $0x1d0] sm:$0xff]  ;;  %v272_v11 = vld [vmem:[#allocation2 + $0x378] sm:$0xff]  ;;  %v274_v13 = vld [vmem:[#allocation2 + $0x3a0] sm:$0xff]  ;;  %v740_v22 = vpack.c.bf16 %v269_v10, %v267_v9 }
 0x110   :  { %773 = vmatpush1.bf16.msra.mxu1 %v772_v52  ;;  %v782_v15 = vpack.c.bf16 %v399_v6, %v397_v5  ;;  %v396_v17 = vld [vmem:[#allocation2 + $0x1a0] sm:$0xff]  ;;  %v401_v20 = vld [vmem:[#allocation2 + $0x1f8] sm:$0xff]  ;;  %v742_v23 = vpack.c.bf16 %v274_v13, %v272_v11  ;;  %v271_v24 = vld [vmem:[#allocation2 + $0x370] sm:$0xff] }
 0x111   :  { %721 = vmatpush1.bf16.msra.mxu0 %v720_v12  ;;  %775 = vmatprep.subr.bf16.mxu1 %v774_v54  ;;  %v780_v12 = vpack.c.bf16 %v394_v4, %v392_v3  ;;  %v403_v21 = vld [vmem:[#allocation2 + $0x220] sm:$0xff]  ;;  %v273_v25 = vld [vmem:[#allocation2 + $0x398] sm:$0xff]  ;;  %v276_v26 = vld [vmem:[#allocation2 + $0x3c8] sm:$0xff] }
 0x112   :  { %723 = vmatprep.subr.bf16.mxu0 %v722_v19  ;;  %v398_v19 = vld [vmem:[#allocation2 + $0x1c8] sm:$0xff]  ;;  %v278_v28 = vld [vmem:[#allocation2 + $0x3f0] sm:$0xff]  ;;  %v786_v29 = vpack.c.bf16 %v403_v21, %v401_v20  ;;  %v744_v34 = vpack.c.bf16 %v273_v25, %v271_v24  ;;  %v275_v36 = vld [vmem:[#allocation2 + $0x3c0] sm:$0xff] }
 0x113   :  { %v784_v27 = vpack.c.bf16 %v398_v19, %v396_v17  ;;  %v400_v30 = vld [vmem:[#allocation2 + $0x1f0] sm:$0xff]  ;;  %v405_v32 = vld [vmem:[#allocation2 + $0x248] sm:$0xff]  ;;  %v280_v39 = vld [vmem:[#allocation2 + $0x418] sm:$0xff] }
 0x114   :  { %777 = vmatpush1.bf16.msra.mxu1 %v776_v0  ;;  %v407_v33 = vld [vmem:[#allocation2 + $0x270] sm:$0xff]  ;;  %v277_v38 = vld [vmem:[#allocation2 + $0x3e8] sm:$0xff]  ;;  %v282_v41 = vld [vmem:[#allocation2 + $0x440] sm:$0xff] }
 0x115   :  { %725 = vmatpush1.bf16.msra.mxu0 %v724_v31  ;;  %779 = vmatprep.subr.bf16.mxu1 %v778_v2  ;;  %v402_v31 = vld [vmem:[#allocation2 + $0x218] sm:$0xff]  ;;  %v790_v42 = vpack.c.bf16 %v407_v33, %v405_v32  ;;  %v404_v43 = vld [vmem:[#allocation2 + $0x240] sm:$0xff]  ;;  %v406_v44 = vld [vmem:[#allocation2 + $0x268] sm:$0xff] }
 0x116   :  { %727 = vmatprep.subr.bf16.mxu0 %v726_v35  ;;  %v746_v35 = vpack.c.bf16 %v278_v28, %v276_v26  ;;  %v788_v40 = vpack.c.bf16 %v402_v31, %v400_v30  ;;  %v409_v45 = vld [vmem:[#allocation2 + $0x298] sm:$0xff]  ;;  %v411_v46 = vld [vmem:[#allocation2 + $0x2c0] sm:$0xff]  ;;  %v279_v49 = vld [vmem:[#allocation2 + $0x410] sm:$0xff]  ;;  %v792_v52 = vpack.c.bf16 %v406_v44, %v404_v43 }
 0x117   :  { %v281_v50 = vld [vmem:[#allocation2 + $0x438] sm:$0xff]  ;;  %v284_v51 = vld [vmem:[#allocation2 + $0x468] sm:$0xff]  ;;  %v286_v53 = vld [vmem:[#allocation2 + $0x490] sm:$0xff]  ;;  %v794_v54 = vpack.c.bf16 %v411_v46, %v409_v45 }
 0x118   :  { %781 = vmatpush1.bf16.msra.mxu1 %v780_v12  ;;  %v408_v55 = vld [vmem:[#allocation2 + $0x290] sm:$0xff]  ;;  %v410_v56 = vld [vmem:[#allocation2 + $0x2b8] sm:$0xff]  ;;  %v413_v57 = vld [vmem:[#allocation2 + $0x2e8] sm:$0xff] }
 0x119   :  { %729 = vmatpush1.bf16.msra.mxu0 %v728_v47  ;;  %783 = vmatprep.subr.bf16.mxu1 %v782_v15  ;;  %v748_v47 = vpack.c.bf16 %v277_v38, %v275_v36  ;;  %v415_v58 = vld [vmem:[#allocation2 + $0x310] sm:$0xff]  ;;  %v283_v61 = vld [vmem:[#allocation2 + $0x460] sm:$0xff]  ;;  %v285_v62 = vld [vmem:[#allocation2 + $0x488] sm:$0xff]  ;;  %v796_v0 = vpack.c.bf16 %v410_v56, %v408_v55 }
 0x11a   :  { %731 = vmatprep.subr.bf16.mxu0 %v730_v48  ;;  %v750_v48 = vpack.c.bf16 %v282_v41, %v280_v39  ;;  %v288_v63 = vld [vmem:[#allocation2 + $0x4b8] sm:$0xff]  ;;  %v290_v1 = vld [vmem:[#allocation2 + $0x4e0] sm:$0xff]  ;;  %v798_v2 = vpack.c.bf16 %v415_v58, %v413_v57  ;;  %v414_v4 = vld [vmem:[#allocation2 + $0x308] sm:$0xff] }
 0x11b   :  { %v412_v3 = vld [vmem:[#allocation2 + $0x2e0] sm:$0xff]  ;;  %v417_v5 = vld [vmem:[#allocation2 + $0x338] sm:$0xff]  ;;  %v287_v9 = vld [vmem:[#allocation2 + $0x4b0] sm:$0xff] }
 0x11c   :  { %785 = vmatpush1.bf16.msra.mxu1 %v784_v27  ;;  %v419_v6 = vld [vmem:[#allocation2 + $0x360] sm:$0xff]  ;;  %v289_v10 = vld [vmem:[#allocation2 + $0x4d8] sm:$0xff]  ;;  %v800_v11 = vpack.c.bf16 %v414_v4, %v412_v3  ;;  %v416_v13 = vld [vmem:[#allocation2 + $0x330] sm:$0xff] }
 0x11d   :  { %733 = vmatpush1.bf16.msra.mxu0 %v732_v59  ;;  %787 = vmatprep.subr.bf16.mxu1 %v786_v29  ;;  %v752_v59 = vpack.c.bf16 %v281_v50, %v279_v49  ;;  %v802_v12 = vpack.c.bf16 %v419_v6, %v417_v5  ;;  %v418_v15 = vld [vmem:[#allocation2 + $0x358] sm:$0xff]  ;;  %v421_v17 = vld [vmem:[#allocation2 + $0x388] sm:$0xff]  ;;  %v423_v19 = vld [vmem:[#allocation2 + $0x3b0] sm:$0xff]  ;;  %v760_v20 = vpack.c.bf16 %v289_v10, %v287_v9 }
 0x11e   :  { %735 = vmatprep.subr.bf16.mxu0 %v734_v60  ;;  %v754_v60 = vpack.c.bf16 %v286_v53, %v284_v51  ;;  %v804_v21 = vpack.c.bf16 %v418_v15, %v416_v13  ;;  %v422_v24 = vld [vmem:[#allocation2 + $0x3a8] sm:$0xff]  ;;  %v425_v25 = vld [vmem:[#allocation2 + $0x3d8] sm:$0xff]  ;;  %v427_v26 = vld [vmem:[#allocation2 + $0x400] sm:$0xff] }
 0x11f   :  { %v810_v28 = vpack.c.bf16 %v427_v26, %v425_v25  ;;  %v424_v29 = vld [vmem:[#allocation2 + $0x3d0] sm:$0xff]  ;;  %v426_v30 = vld [vmem:[#allocation2 + $0x3f8] sm:$0xff]  ;;  %v429_v31 = vld [vmem:[#allocation2 + $0x428] sm:$0xff] }
 0x120   :  { %789 = vmatpush1.bf16.msra.mxu1 %v788_v40  ;;  %v431_v32 = vld [vmem:[#allocation2 + $0x450] sm:$0xff]  ;;  %v812_v33 = vpack.c.bf16 %v426_v30, %v424_v29  ;;  %v430_v36 = vld [vmem:[#allocation2 + $0x448] sm:$0xff]  ;;  %v433_v38 = vld [vmem:[#allocation2 + $0x478] sm:$0xff] }
 0x121   :  { %737 = vmatpush1.bf16.msra.mxu0 %v736_v7  ;;  %791 = vmatprep.subr.bf16.mxu1 %v790_v42  ;;  %v756_v7 = vpack.c.bf16 %v285_v62, %v283_v61  ;;  %v435_v39 = vld [vmem:[#allocation2 + $0x4a0] sm:$0xff]  ;;  %v432_v42 = vld [vmem:[#allocation2 + $0x470] sm:$0xff]  ;;  %v434_v43 = vld [vmem:[#allocation2 + $0x498] sm:$0xff] }
 0x122   :  { %739 = vmatprep.subr.bf16.mxu0 %v738_v8  ;;  %v758_v8 = vpack.c.bf16 %v290_v1, %v288_v63  ;;  %v818_v41 = vpack.c.bf16 %v435_v39, %v433_v38  ;;  %v820_v44 = vpack.c.bf16 %v434_v43, %v432_v42  ;;  %v439_v45 = vld [vmem:[#allocation2 + $0x4f0] sm:$0xff]  ;;  %v541_v50 = vld [vmem:[#allocation2 + $0x2a0] sm:$0xff]  ;;  %v542_v51 = vld [vmem:[#allocation2 + $0x2c8] sm:$0xff] }
 0x123   :  { %v826_v53 = vpack.c.bf16 %v542_v51, %v541_v50  ;;  %v543_v55 = vld [vmem:[#allocation2 + $0x2f0] sm:$0xff]  ;;  %v544_v56 = vld [vmem:[#allocation2 + $0x318] sm:$0xff]  ;;  %v545_v61 = vld [vmem:[#allocation2 + $0x340] sm:$0xff] }
 0x124   :  { %793 = vmatpush1.bf16.msra.mxu1 %v792_v52  ;;  %v525_v52 = vld [vmem:[#allocation2 + $0x20] sm:$0xff]  ;;  %v830_v58 = vpack.c.bf16 %v544_v56, %v543_v55  ;;  %v546_v62 = vld [vmem:[#allocation2 + $0x368] sm:$0xff]  ;;  %v547_v3 = vld [vmem:[#allocation2 + $0x390] sm:$0xff] }
 0x125   :  { %741 = vmatpush1.bf16.msra.mxu0 %v740_v22  ;;  %795 = vmatprep.subr.bf16.mxu1 %v794_v54  ;;  %v806_v22 = vpack.c.bf16 %v423_v19, %v421_v17  ;;  %v526_v54 = vld [vmem:[#allocation2 + $0x48] sm:$0xff]  ;;  %v529_v1 = vld [vmem:[#allocation2 + $0xc0] sm:$0xff]  ;;  %v548_v4 = vld [vmem:[#allocation2 + $0x3b8] sm:$0xff] }
 0x126   :  { %743 = vmatprep.subr.bf16.mxu0 %v742_v23  ;;  %v420_v23 = vld [vmem:[#allocation2 + $0x380] sm:$0xff]  ;;  %v828_v57 = vpack.c.bf16 %v526_v54, %v525_v52  ;;  %v838_v6 = vpack.c.bf16 %v548_v4, %v547_v3  ;;  %v550_v10 = vld [vmem:[#allocation2 + $0x408] sm:$0xff]  ;;  %v551_v17 = vld [vmem:[#allocation2 + $0x430] sm:$0xff] }
 0x127   :  { %v808_v27 = vpack.c.bf16 %v422_v24, %v420_v23  ;;  %v549_v9 = vld [vmem:[#allocation2 + $0x3e0] sm:$0xff]  ;;  %v534_v15 = vld [vmem:[#allocation2 + $0x188] sm:$0xff]  ;;  %v552_v19 = vld [vmem:[#allocation2 + $0x458] sm:$0xff] }
 0x128   :  { %797 = vmatpush1.bf16.msra.mxu1 %v796_v0  ;;  %v834_v0 = vpack.c.bf16 %v546_v62, %v545_v61  ;;  %v533_v13 = vld [vmem:[#allocation2 + $0x160] sm:$0xff]  ;;  %v536_v23 = vld [vmem:[#allocation2 + $0x1d8] sm:$0xff]  ;;  %v554_v25 = vld [vmem:[#allocation2 + $0x4a8] sm:$0xff] }
 0x129   :  { %745 = vmatpush1.bf16.msra.mxu0 %v744_v34  ;;  %799 = vmatprep.subr.bf16.mxu1 %v798_v2  ;;  %v814_v34 = vpack.c.bf16 %v431_v32, %v429_v31  ;;  %v530_v2 = vld [vmem:[#allocation2 + $0xe8] sm:$0xff]  ;;  %v553_v24 = vld [vmem:[#allocation2 + $0x480] sm:$0xff]  ;;  %v556_v42 = vld [vmem:[#allocation2 + $0x4f8] sm:$0xff] }
 0x12a   :  { %747 = vmatprep.subr.bf16.mxu0 %v746_v35  ;;  %v428_v35 = vld [vmem:[#allocation2 + $0x420] sm:$0xff]  ;;  %v836_v5 = vpack.c.bf16 %v530_v2, %v529_v1  ;;  %v538_v39 = vld [vmem:[#allocation2 + $0x228] sm:$0xff] }
 0x12b   :  { %v816_v40 = vpack.c.bf16 %v430_v36, %v428_v35  ;;  %v537_v38 = vld [vmem:[#allocation2 + $0x200] sm:$0xff]  ;;  %v653_v56 = vld [vmem:[%s1000_s2 + $0x8] ss:$0 sm:$0xff] }
 0x12c   :  { %801 = vmatpush1.bf16.msra.mxu1 %v800_v11 }
 0x12d   :  { %749 = vmatpush1.bf16.msra.mxu0 %v748_v47  ;;  %803 = vmatprep.subr.bf16.mxu1 %v802_v12  ;;  %v436_v47 = vld [vmem:[#allocation2 + $0x4c0] sm:$0xff]  ;;  %v842_v12 = vpack.c.bf16 %v550_v10, %v549_v9 }
 0x12e   :  { %751 = vmatprep.subr.bf16.mxu0 %v750_v48  ;;  %v438_v48 = vld [vmem:[#allocation2 + $0x4e8] sm:$0xff] }
 0x12f   :  { %v824_v49 = vpack.c.bf16 %v438_v48, %v436_v47 }
 0x130   :  { %805 = vmatpush1.bf16.msra.mxu1 %v804_v21  ;;  %v846_v21 = vpack.c.bf16 %v552_v19, %v551_v17 }
 0x131   :  { %753 = vmatpush1.bf16.msra.mxu0 %v752_v59  ;;  %807 = vmatprep.subr.bf16.mxu1 %v806_v22  ;;  %v527_v59 = vld [vmem:[#allocation2 + $0x70] sm:$0xff] }
 0x132   :  { %755 = vmatprep.subr.bf16.mxu0 %v754_v60  ;;  %v528_v60 = vld [vmem:[#allocation2 + $0x98] sm:$0xff]  ;;  %v535_v22 = vld [vmem:[#allocation2 + $0x1b0] sm:$0xff] }
 0x133   :  { %v832_v63 = vpack.c.bf16 %v528_v60, %v527_v59  ;;  %v848_v26 = vpack.c.bf16 %v536_v23, %v535_v22 }
 0x134   :  { %809 = vmatpush1.bf16.msra.mxu1 %v808_v27  ;;  %v850_v27 = vpack.c.bf16 %v554_v25, %v553_v24 }
 0x135   :  { %757 = vmatpush1.bf16.msra.mxu0 %v756_v7  ;;  %811 = vmatprep.subr.bf16.mxu1 %v810_v28  ;;  %v531_v7 = vld [vmem:[#allocation2 + $0x110] sm:$0xff]  ;;  %v291_v28 = vld [vmem:[%s1000_s2 + $0x4] sm:$0x3] }
 0x136   :  { %759 = vmatprep.subr.bf16.mxu0 %v758_v8  ;;  %v532_v8 = vld [vmem:[#allocation2 + $0x138] sm:$0xff]  ;;  %v296_v29 = vrot.slane %v291_v28, %v969_v16  ;;  %v300_v30 = vrot.slane %v291_v28, %v974_v18 }
 0x137   :  { %v840_v11 = vpack.c.bf16 %v532_v8, %v531_v7 }
 0x138   :  { %813 = vmatpush1.bf16.msra.mxu1 %v812_v33 }
 0x139   :  { %761 = vmatpush1.bf16.msra.mxu0 %v760_v20  ;;  %815 = vmatprep.subr.bf16.mxu1 %v814_v34  ;;  %v844_v20 = vpack.c.bf16 %v534_v15, %v533_v13 }
 0x13a   :  { %827 = vmatprep.subr.bf16.mxu0 %v826_v53 }
 0x13c   :  { %368 = vmatmul.mubr.f32.vlgmr.msra.gmra.mrb[0].mxu0 %v978_v37  ;;  %817 = vmatpush1.bf16.msra.mxu1 %v816_v40  ;;  %v437_v37 = vld [vmem:[#allocation2 + $0x4c8] sm:$0xff]  ;;  %v852_v40 = vpack.c.bf16 %v538_v39, %v537_v38 }
 0x13d   :  { %819 = vmatprep.subr.bf16.mxu1 %v818_v41  ;;  %v822_v46 = vpack.c.bf16 %v439_v45, %v437_v37  ;;  %829 = vmatpush3.bf16.msra.mxu0 %v828_v57  ;;  %v555_v41 = vld [vmem:[#allocation2 + $0x4d0] sm:$0xff]  ;;  %v540_v37 = vld [vmem:[#allocation2 + $0x278] sm:$0xff] }
 0x13e   :  { %831 = vmatprep.subr.bf16.mxu0 %v830_v58  ;;  %v854_v43 = vpack.c.bf16 %v556_v42, %v555_v41  ;;  %v635_v58 = vand.u32 127, %v51_v14 }
 0x140   :  { %821 = vmatpush1.bf16.msra.mxu1 %v820_v44  ;;  %v539_v44 = vld [vmem:[#allocation2 + $0x250] sm:$0xff]  ;;  %vm636_vm1 = vcmp.lt.s32.totalorder %v635_v58, 32 }
 0x141   :  { %823 = vmatprep.subr.bf16.mxu1 %v822_v46  ;;  %833 = vmatpush3.bf16.msra.mxu0 %v832_v63  ;;  %v856_v45 = vpack.c.bf16 %v540_v37, %v539_v44  ;;  %v440_v46 = vld [vmem:[%s1000_s2 + $0x6] sm:$0x3] }
 0x142   :  { %835 = vmatprep.subr.bf16.mxu0 %v834_v0  ;;  %v445_v47 = vrot.slane %v440_v46, %v969_v16  ;;  %v449_v48 = vrot.slane %v440_v46, %v974_v18 }
 0x144   :  { %825 = vmatpush1.bf16.msra.mxu1 %v824_v49 }
 0x145   :  { %837 = vmatpush3.bf16.msra.mxu0 %v836_v5 }
 0x146   :  { %839 = vmatprep.subr.bf16.mxu0 %v838_v6 }
 0x149   :  { %841 = vmatpush3.bf16.msra.mxu0 %v840_v11 }
 0x14a   :  { %843 = vmatprep.subr.bf16.mxu0 %v842_v12 }
 0x14d   :  { %845 = vmatpush3.bf16.msra.mxu0 %v844_v20 }
 0x14e   :  { %847 = vmatprep.subr.bf16.mxu0 %v846_v21 }
 0x151   :  { %849 = vmatpush3.bf16.msra.mxu0 %v848_v26 }
 0x152   :  { %851 = vmatprep.subr.bf16.mxu0 %v850_v27 }
 0x155   :  { %853 = vmatpush3.bf16.msra.mxu0 %v852_v40 }
 0x156   :  { %855 = vmatprep.subr.bf16.mxu0 %v854_v43 }
 0x159   :  { %857 = vmatpush3.bf16.msra.mxu0 %v856_v45 }
 0x20f   :  { %v369_v31 = vpop.f32.mrb[0].mxu0 }
 0x210   :  { %v370_v32 = vadd.f32 %v369_v31, %v296_v29  ;;  %v371_v33 = vpop.f32.mrb[1].mxu0 }
 0x211   :  { %v372_v34 = vadd.f32 %v371_v33, %v300_v30 }
 0x212   :  { %v374_v36 = vmax.f32 %v370_v32, 0.0 }
 0x213   :  { %v375_v35 = vmax.f32 %v372_v34, 0.0 }
 0x215   :  { %516 = vmatprep.mubr.f32.mxu1 %v375_v35 }
 0x216   :  { %517 = vmatmul.mubr.f32.vlgmr.msra.gmra.mrb[4].mxu1 %v374_v36 }
 0x2e9   :  { %v518_v49 = vpop.f32.mrb[4].mxu1 }
 0x2ea   :  { %v519_v50 = vadd.f32 %v518_v49, %v445_v47  ;;  %v520_v51 = vpop.f32.mrb[5].mxu1 }
 0x2eb   :  { %v521_v52 = vadd.f32 %v520_v51, %v449_v48 }
 0x2ec   :  { %v523_v54 = vmax.f32 %v519_v50, 0.0 }
 0x2ed   :  { %v524_v53 = vmax.f32 %v521_v52, 0.0 }
 0x2ef   :  { %628 = vmatprep.mubr.f32.mxu0 %v524_v53 }
 0x2f0   :  { %629 = vmatmul.mubr.f32.vlgmr.msra.gmra.mrb[2].mxu0 %v523_v54 }
 0x3c3   :  { %v687_v55 = vpop.f32.mrb[2].mxu0 }
 0x3c4   :  { %v688_v57 = vpop.f32.mrb[3].mxu0 }
 0x3c5   :  { %v689_v59 = vadd.f32 %v688_v57, %v687_v55 }
 0x3c7   :  { %v631_v16 = vadd.f32 %v689_v59, %v653_v56 }
 0x3c9   :  { %v637_v18 = vmax.f32 %v631_v16, 0.0 }
 0x3cb   :  { %v638_v60 = vsel %vm636_vm1, %v637_v18, %v631_v16 }
 0x3cc   :  { %639 = vst [vmem:[%s1002_s4] sm:$0xff] %v638_v60 }
 0x3cd   :  { %644 = vsyncpa [#allocation5], 1 }
 0x3ce   :  { %645 = vsyncmov [#allocation3] }
 0x3d1   :  { %s646_s24 = vpop.sfrf %645 }
 0x3d2   :  { %p654_p2 = scmp.ne.s32.totalorder %s646_s24, 0 }
 0x3d4   :  { %650 = shalt.err (%p654_p2)  }

</bundles_post_ra>
